<compile_context>
chip_gen: v7x
topology: tpu7x:2x2x1
jax: 0.10.0
libtpu: 0.0.40
codegen_flags: <defaults>
</compile_context>

<pallas_src>
import jax
import jax.numpy as jnp
from jax.experimental import pallas as pl
from jax.experimental.pallas import tpu as pltpu

EPS = 1e-5


def _round_up(x, m):
    return ((x + m - 1) // m) * m


def prenorm_kernel(x_ref, gamma_ref, beta_ref, w_ref, b_ref, o_ref):
    # x_ref:     (T, D)  token tile
    # gamma_ref: (1, D)  LayerNorm weight   (VMEM resident, f32)
    # beta_ref:  (1, D)  LayerNorm bias     (VMEM resident, f32)
    # w_ref:     (D, H)  fn (Linear) weight (VMEM resident, bf16, pre-transposed)
    # b_ref:     (1, H)  fn (Linear) bias   (VMEM resident, f32)
    # o_ref:     (T, H)
    x = x_ref[...].astype(jnp.float32)                      # LN math in f32

    # ---- LayerNorm over last axis (biased variance, eps inside rsqrt) ----
    mean = jnp.mean(x, axis=-1, keepdims=True)               # (T, 1)
    mean_sq = jnp.mean(x * x, axis=-1, keepdims=True)        # (T, 1)
    var = jnp.maximum(mean_sq - mean * mean, 0.0)            # clamp: no NaN path
    x_hat = (x - mean) * jax.lax.rsqrt(var + EPS)            # (T, D)
    y = x_hat * gamma_ref[...] + beta_ref[...]               # (T, D), f32

    # ---- fn: Linear(dim -> hidden); bf16 operands, f32 accumulation ----
    out = jnp.dot(y.astype(jnp.bfloat16), w_ref[...],
                  preferred_element_type=jnp.float32)        # (T, H)
    out = out + b_ref[...]                                   # (T, H) + (1, H)
    o_ref[...] = out.astype(o_ref.dtype)


def prepare_prenorm_params(gamma, beta, w, b):
    """One-time parameter prep (hoisted out of the per-call hot path).

    gamma/beta: (D,) LayerNorm affine;  w: (H, D) PyTorch Linear weight;  b: (H,).
    Returns (gamma2d, beta2d, w_t_bf16, b2d) ready for `prenorm`.
    """
    D = gamma.shape[0]
    H = w.shape[0]
    return (gamma.reshape(1, D).astype(jnp.float32),
            beta.reshape(1, D).astype(jnp.float32),
            w.T.astype(jnp.bfloat16),              # (D, H) for the MXU
            b.reshape(1, H).astype(jnp.float32))


def _pick_token_tile(M, block_tokens):
    """Token tile T: multiple of 8 sublanes; >=2 grid tiles when possible so
    real rows split evenly across tiles (helps v7x's two TensorCores)."""
    if M <= 8:
        return 8
    num_tiles = max(2, pl.cdiv(M, block_tokens))
    return _round_up(pl.cdiv(M, num_tiles), 8)


def prenorm(x, params, *, block_tokens=1024):
    """PreNorm forward: Linear(LayerNorm(x)).

    x: (B, N, D); params: output of prepare_prenorm_params.
    """
    gamma2d, beta2d, w_t, b2d = params
    B, N, D = x.shape
    H = w_t.shape[1]
    M = B * N

    x2d = x.reshape(M, D)                      # flatten tokens; no padding
    T = _pick_token_tile(M, block_tokens)
    grid = (pl.cdiv(M, T),)                    # ragged last tile handled by Pallas

    # VMEM budget: double-buffered x & out tiles + resident params, with headroom.
    ib = jnp.dtype(x.dtype).itemsize
    vmem_bytes = 2 * (2 * T * D * ib + 2 * T * H * ib
                      + D * H * 2 + (2 * D + H) * 4) + (2 << 20)
    vmem_bytes = int(min(max(vmem_bytes, 4 << 20), 64 << 20))

    out2d = pl.pallas_call(
        prenorm_kernel,
        out_shape=jax.ShapeDtypeStruct((M, H), x.dtype),
        grid_spec=pltpu.PrefetchScalarGridSpec(
            num_scalar_prefetch=0,
            grid=grid,
            in_specs=[
                # Pipelined activation tiles over the flattened token axis.
                pl.BlockSpec((T, D), lambda i: (i, 0)),
                # Grid-invariant params: full-array VMEM residents (single-buffered).
                pl.BlockSpec(memory_space=pltpu.MemorySpace.VMEM),
                pl.BlockSpec(memory_space=pltpu.MemorySpace.VMEM),
                pl.BlockSpec(memory_space=pltpu.MemorySpace.VMEM),
                pl.BlockSpec(memory_space=pltpu.MemorySpace.VMEM),
            ],
            out_specs=pl.BlockSpec((T, H), lambda i: (i, 0)),
        ),
        compiler_params=pltpu.CompilerParams(
            dimension_semantics=("parallel",),
            vmem_limit_bytes=vmem_bytes),
    )(x2d, gamma2d, beta2d, w_t, b2d)

    return out2d.reshape(B, N, H)


def prenorm_ref(x, gamma, beta, w, b):
    """Pure-JAX reference (same bf16-operand matmul as the kernel)."""
    xf = x.astype(jnp.float32)
    mean = jnp.mean(xf, axis=-1, keepdims=True)
    var = jnp.mean((xf - mean) ** 2, axis=-1, keepdims=True)
    y = (xf - mean) * jax.lax.rsqrt(var + EPS) * gamma + beta
    out = jnp.dot(y.astype(jnp.bfloat16), w.T.astype(jnp.bfloat16),
                  preferred_element_type=jnp.float32) + b
    return out.astype(x.dtype)


if __name__ == "__main__":
    key = jax.random.PRNGKey(0)
    # batch, tokens, dim, fn-hidden.  D and H lane-dense (multiples of 128);
    # B*N = 320 tokens -> two balanced 160-row tiles (multi-step grid, no padding).
    B, N, D, H = 2, 160, 128, 128

    k_x, k_g, k_b, k_w, k_wb = jax.random.split(key, 5)
    x = jax.random.normal(k_x, (B, N, D), dtype=jnp.float32)
    # nn.LayerNorm(dim) init: weight=1, bias=0 — perturb slightly but deterministically
    gamma = jnp.ones((D,), jnp.float32) + 0.01 * jax.random.normal(k_g, (D,))
    beta = 0.01 * jax.random.normal(k_b, (D,), dtype=jnp.float32)
    # fn = Linear(dim, hidden): weight (H, D), bias (H,)
    w = jax.random.normal(k_w, (H, D), dtype=jnp.float32) * (1.0 / jnp.sqrt(D))
    b = 0.01 * jax.random.normal(k_wb, (H,), dtype=jnp.float32)

    params = prepare_prenorm_params(gamma, beta, w, b)   # one-time prep
    out = prenorm(x, params)
    out = jax.block_until_ready(out)

    ref = prenorm_ref(x, gamma, beta, w, b)
    assert out.shape == (B, N, H)
    # bf16 matmul operands -> slightly looser tolerance than a pure-f32 check.
    assert jnp.allclose(out, ref, atol=5e-2, rtol=5e-2), "mismatch vs reference"
    print("KERNEL_OK")
</pallas_src>

<mosaic_0001>
module attributes {stable_mosaic.version = 11 : i64} {
  func.func @prenorm_kernel(%arg0: i32, %arg1: memref<160x128xf32, #tpu.memory_space<vmem>>, %arg2: memref<1x128xf32, #tpu.memory_space<vmem>>, %arg3: memref<1x128xf32, #tpu.memory_space<vmem>>, %arg4: memref<128x128xbf16, #tpu.memory_space<vmem>>, %arg5: memref<1x128xf32, #tpu.memory_space<vmem>>, %arg6: memref<160x128xf32, #tpu.memory_space<vmem>>) attributes {dimension_semantics = [#tpu.dimension_semantics<parallel>], iteration_bounds = array<i64: 2>, scalar_prefetch = 0 : i64, scratch_operands = 0 : i64, tpu.core_type = #tpu.core_type<tc>, window_params = [{transform_indices = @transform_0, window_bounds = array<i64: 160, 128>}, {pipeline_mode = #tpu.pipeline_mode<synchronous>, transform_indices = @transform_1, window_bounds = array<i64: 1, 128>}, {pipeline_mode = #tpu.pipeline_mode<synchronous>, transform_indices = @transform_2, window_bounds = array<i64: 1, 128>}, {pipeline_mode = #tpu.pipeline_mode<synchronous>, transform_indices = @transform_3, window_bounds = array<i64: 128, 128>}, {pipeline_mode = #tpu.pipeline_mode<synchronous>, transform_indices = @transform_4, window_bounds = array<i64: 1, 128>}, {transform_indices = @transform_5, window_bounds = array<i64: 160, 128>}]} {
    %c0 = arith.constant 0 : index
    %c0_0 = arith.constant 0 : index
    %0 = vector.load %arg1[%c0, %c0_0] : memref<160x128xf32, #tpu.memory_space<vmem>>, vector<160x128xf32>
    %cst = arith.constant dense<0.000000e+00> : vector<160xf32>
    %1 = vector.multi_reduction <add>, %0, %cst [1] : vector<160x128xf32> to vector<160xf32>
    %2 = vector.shape_cast %1 : vector<160xf32> to vector<160x1xf32>
    %cst_1 = arith.constant 1.280000e+02 : f32
    %3 = vector.broadcast %cst_1 : f32 to vector<160x1xf32>
    %4 = arith.divf %2, %3 : vector<160x1xf32>
    %5 = arith.mulf %0, %0 : vector<160x128xf32>
    %cst_2 = arith.constant dense<0.000000e+00> : vector<160xf32>
    %6 = vector.multi_reduction <add>, %5, %cst_2 [1] : vector<160x128xf32> to vector<160xf32>
    %7 = vector.shape_cast %6 : vector<160xf32> to vector<160x1xf32>
    %cst_3 = arith.constant 1.280000e+02 : f32
    %8 = vector.broadcast %cst_3 : f32 to vector<160x1xf32>
    %9 = arith.divf %7, %8 : vector<160x1xf32>
    %10 = arith.mulf %4, %4 : vector<160x1xf32>
    %11 = arith.subf %9, %10 : vector<160x1xf32>
    %cst_4 = arith.constant 0.000000e+00 : f32
    %12 = vector.broadcast %cst_4 : f32 to vector<160x1xf32>
    %13 = arith.maximumf %11, %12 : vector<160x1xf32>
    %14 = vector.broadcast %4 : vector<160x1xf32> to vector<160x128xf32>
    %15 = arith.subf %0, %14 : vector<160x128xf32>
    %cst_5 = arith.constant 9.99999974E-6 : f32
    %16 = vector.broadcast %cst_5 : f32 to vector<160x1xf32>
    %17 = arith.addf %13, %16 : vector<160x1xf32>
    %18 = math.rsqrt %17 : vector<160x1xf32>
    %19 = vector.broadcast %18 : vector<160x1xf32> to vector<160x128xf32>
    %20 = arith.mulf %15, %19 : vector<160x128xf32>
    %c0_6 = arith.constant 0 : index
    %c0_7 = arith.constant 0 : index
    %21 = vector.load %arg2[%c0_6, %c0_7] : memref<1x128xf32, #tpu.memory_space<vmem>>, vector<1x128xf32>
    %22 = vector.broadcast %21 : vector<1x128xf32> to vector<160x128xf32>
    %23 = arith.mulf %20, %22 : vector<160x128xf32>
    %c0_8 = arith.constant 0 : index
    %c0_9 = arith.constant 0 : index
    %24 = vector.load %arg3[%c0_8, %c0_9] : memref<1x128xf32, #tpu.memory_space<vmem>>, vector<1x128xf32>
    %25 = vector.broadcast %24 : vector<1x128xf32> to vector<160x128xf32>
    %26 = arith.addf %23, %25 : vector<160x128xf32>
    %27 = arith.truncf %26 : vector<160x128xf32> to vector<160x128xbf16>
    %c0_10 = arith.constant 0 : index
    %c0_11 = arith.constant 0 : index
    %28 = vector.load %arg4[%c0_10, %c0_11] : memref<128x128xbf16, #tpu.memory_space<vmem>>, vector<128x128xbf16>
    %cst_12 = arith.constant dense<0.000000e+00> : vector<160x128xf32>
    %29 = tpu.matmul %27, %28, %cst_12 {dimension_numbers = #tpu.dot_dimension_numbers<[1], [0], [0], [1], [0, 0, 1, 1], [], []>} : vector<160x128xbf16>, vector<128x128xbf16>, vector<160x128xf32> -> vector<160x128xf32>
    %c0_13 = arith.constant 0 : index
    %c0_14 = arith.constant 0 : index
    %30 = vector.load %arg5[%c0_13, %c0_14] : memref<1x128xf32, #tpu.memory_space<vmem>>, vector<1x128xf32>
    %31 = vector.broadcast %30 : vector<1x128xf32> to vector<160x128xf32>
    %32 = arith.addf %29, %31 : vector<160x128xf32>
    %c0_15 = arith.constant 0 : index
    %c0_16 = arith.constant 0 : index
    %33 = vector.load %arg6[%c0_15, %c0_16] : memref<160x128xf32, #tpu.memory_space<vmem>>, vector<160x128xf32>
    tpu.vector_store %arg6[%c0_15, %c0_16], %32 {strides = array<i32>} : memref<160x128xf32, #tpu.memory_space<vmem>>, vector<160x128xf32>,
    return
  }
  func.func @transform_0(%arg0: i32) -> (i32, i32) {
    %c0_i32 = arith.constant 0 : i32
    %c0_i32_0 = arith.constant 0 : i32
    return %arg0, %c0_i32 : i32, i32
  }
  func.func @transform_1(%arg0: i32) -> (i32, i32) {
    %c0_i32 = arith.constant 0 : i32
    %c0_i32_0 = arith.constant 0 : i32
    %c0_i32_1 = arith.constant 0 : i32
    return %c0_i32, %c0_i32_0 : i32, i32
  }
  func.func @transform_2(%arg0: i32) -> (i32, i32) {
    %c0_i32 = arith.constant 0 : i32
    %c0_i32_0 = arith.constant 0 : i32
    %c0_i32_1 = arith.constant 0 : i32
    return %c0_i32, %c0_i32_0 : i32, i32
  }
  func.func @transform_3(%arg0: i32) -> (i32, i32) {
    %c0_i32 = arith.constant 0 : i32
    %c0_i32_0 = arith.constant 0 : i32
    %c0_i32_1 = arith.constant 0 : i32
    return %c0_i32, %c0_i32_0 : i32, i32
  }
  func.func @transform_4(%arg0: i32) -> (i32, i32) {
    %c0_i32 = arith.constant 0 : i32
    %c0_i32_0 = arith.constant 0 : i32
    %c0_i32_1 = arith.constant 0 : i32
    return %c0_i32, %c0_i32_0 : i32, i32
  }
  func.func @transform_5(%arg0: i32) -> (i32, i32) {
    %c0_i32 = arith.constant 0 : i32
    %c0_i32_0 = arith.constant 0 : i32
    return %arg0, %c0_i32 : i32, i32
  }
}

</mosaic_0001>

<bundles_post_ra>
// kernel: tpu_custom_call.1
= control target key start
LH: loop header
LB: loop body
LE: loop exit
PB: predicated region body
PF: predicated region fallthrough
CT: control target
= control target key end

     0   :  { %10 = vsyncpa [#allocation3], 0  ;;  %s1832_s0 = inlined_call_operand.hbm [shape: f32[320,128], index: 0, kind: input, shape index: {}]   ;;  %s1833_s1 = inlined_call_operand.vmem [shape: f32[1,128], index: 1, kind: input, shape index: {}]   ;;  %s1834_s2 = inlined_call_operand.vmem [shape: f32[1,128], index: 2, kind: input, shape index: {}]   ;;  %s1835_s3 = inlined_call_operand.hbm [shape: bf16[128,128], index: 3, kind: input, shape index: {}]   ;;  %s1836_s4 = inlined_call_operand.vmem [shape: f32[1,128], index: 4, kind: input, shape index: {}]   ;;  %s1837_s5 = inlined_call_operand.hbm [shape: f32[320,128], index: 5, kind: output, shape index: {}]  }
   0x1   :  { %12 = vsyncpa [#allocation3 + $0x1], 0 }
   0x2   :  { %13 = vsyncpa [#allocation6], 0 }
   0x3   :  { %14 = vsyncpa [#allocation4], 0 }
   0x4   :  { %16 = vsyncpa [#allocation4 + $0x1], 0  ;;  %s1302_s18 = smov 0   ;;  %s1304_s19 = smov 0  }
   0x5   :  { %s1306_s20 = smov 0   ;;  %s1308_s21 = smov 0  }
   0x6 LB: > { %s1323_s22 = sadd.s32 4294967295, %s1261_s21   ;;  %s927_s23 = sadd.s32 4294967294, %s1261_s21   ;;  %s1261_s21 = sphi %s1308_s21, %s1857_s21   ;;  %s1257_s20 = sphi %s1306_s20, %s1856_s20   ;;  %s1253_s19 = sphi %s1304_s19, %s1855_s19   ;;  %s1249_s18 = sphi %s1302_s18, %s1854_s18  }
   0x7   : > { %p42_p0 = scmp.ne.s32.totalorder %s1253_s19, %s1249_s18  ;;  %p1838_p1 = scmp.eq.s32.totalorder %s1323_s22, 0 }
   0x8   : > { %p156_p3 = scmp.eq.s32.totalorder %s927_s23, 1  ;;  %p928_p5 = scmp.ge.s32.totalorder %s1261_s21, 1 }
   0x9   : > { %p1332_p4 = por %p1838_p1, %p42_p0  ;;  %p163_p7 = scmp.lt.s32.totalorder %s1261_s21, 3 }
   0xa   : > { %p1337_p6 = por %p156_p3, %p42_p0  ;;  %s1263_s27 = smov [#allocation5]  }
   0xb   : > { %s1841_s24 = scalar_select %p1332_p4, 1, 0 }
   0xc   : > { %s1842_s25 = scalar_select %p1337_p6, 1, 0 }
   0xd   : > { %p1342_p8 = pnand %p928_p5, %p163_p7  ;;  %s181_s28 = sshll.u32 %s1263_s27, 4  ;;  %s1346_s28 = int_to_ptr.vmem [resolvable:$true] %s181_s28 }
   0xe   : > { %s1358_s30 = sadd.s32 1, %s1261_s21   ;;  %s29_s6 = sadd.s32 1, %s1257_s20 }
   0xf   : > { %s1843_s26 = scalar_select %p1342_p8, 1, 0 }
  0x10   : > { %p1030_p9 = pneg %p1342_p8  ;;  %s26_s7 = ssub.s32 %s1261_s21, %s1358_s30 }
  0x11   : > { %s1133_s10 = scalar_lea.hbm %s1835_s3, 1024 }
  0x12   : > { %p1353_p11 = pnand %p1030_p9, %p1838_p1  ;;  %p1134_p12 = scmp.ne.s32.totalorder %s1835_s3, %s1133_s10 }
  0x13   : > { %p1140_p5 = scmp.lt.u32.totalorder %s1133_s10, %s1835_s3 }
  0x14   : > { %p1135_p13 = pneg %p1353_p11 }
  0x16   : > { %p1136_p0 = pnand %p1135_p13, %p1134_p12 }
  0x18   : > { %p1137_p3 = pneg %p1136_p0 }
  0x1a   : > { %p1142_p7 = pnand %p1140_p5, %p1137_p3 }
  0x1c   : > { %1145 = shalt.err (!%p1142_p7)
}
  0x1d   : > { %s1146_s15 = scalar_lea.vmem %s1346_s28, 1024  ;;  %p1154_p2 = scmp.lt.s32.totalorder %s1346_s28, %s1346_s28 }
  0x1e   : > { %p1147_p9 = scmp.ne.s32.totalorder %s1346_s28, %s1146_s15  ;;  %p1155_p6 = scmp.lt.s32.totalorder %s1146_s15, %s1146_s15 }
  0x20   : > { %p1149_p10 = pnand %p1147_p9, %p1135_p13  ;;  %p1156_p4 = por %p1155_p6, %p1154_p2 }
  0x22   : > { %p1150_p1 = pneg %p1149_p10 }
  0x24   : > { %p1157_p8 = pnand %p1156_p4, %p1150_p1 }
  0x26   : > { %1160 = shalt.err (!%p1157_p8)
}
  0x27   : > { %s1264_s16 = smov 64   ;;  %s1265_s17 = smov 4  }
  0x28   : > { %1033 = dma.hbm_to_vmem [thread:$0]  (!%p1353_p11), %s1835_s3, 1024, %s1346_s28, [#allocation6], %s1264_s16, %s1264_s16, %s1265_s17  }
  0x29   : > { %p27_p2 = scmp.eq.s32.totalorder %s26_s7, 0  ;;  %p36_p1 = scmp.ne.s32.totalorder %s1257_s20, %s1253_s19 }
  0x2a   : > { %p37_p4 = scmp.eq.s32.totalorder %s1261_s21, 0  ;;  %p1043_p6 = scmp.lt.s32.totalorder %s1261_s21, 2 }
  0x2b   : > { %s1389_s8 = scalar_select %p27_p2, %s1257_s20, %s29_s6  }
  0x2c   : > { %p38_p8 = por %p37_p4, %p36_p1  ;;  %p1845_p10 = scmp.eq.s32.totalorder %s1323_s22, 1 }
  0x2d   : > { %s198_s10 = sand.u32 1, %s1257_s20   ;;  %s948_s11 = smul.u32 2560, %s1261_s21 }
  0x2e   : > { %p1393_p12 = por %p1845_p10, %p36_p1  ;;  %s1020_s12 = smul.u32 160, %s198_s10 }
  0x2f   : > { %s1402_s14 = scalar_lea.hbm %s1832_s0, %s948_s11  ;;  %p1404_p11 = pnand %p1043_p6, %p38_p8 }
  0x30   : > { %s202_s6 = scalar_lea.vmem [#allocation2], %s1020_s12  ;;  %s1410_s15 = scalar_lea.sflag [#allocation3], %s198_s10 }
  0x31   : > { %s209_s7 = sshll.u32 %s202_s6, 4  ;;  %s1161_s16 = scalar_lea.hbm %s1402_s14, 2560  ;;  %s1408_s7 = int_to_ptr.vmem [resolvable:$true] %s209_s7 }
  0x32   : > { %p1162_p13 = scmp.ne.s32.totalorder %s1402_s14, %s1161_s16  ;;  %p1163_p0 = pneg %p1404_p11 }
  0x33   : > { %s1166_s27 = scalar_lea.hbm %s1832_s0, 5120  ;;  %p1167_p7 = scmp.lt.u32.totalorder %s1402_s14, %s1832_s0 }
  0x34   : > { %p1164_p3 = pnand %p1163_p0, %p1162_p13  ;;  %p1168_p9 = scmp.lt.u32.totalorder %s1166_s27, %s1161_s16 }
  0x35   : > { %p1170_p1 = scmp.lt.u32.totalorder %s1161_s16, %s1402_s14 }
  0x36   : > { %p1165_p5 = pneg %p1164_p3  ;;  %p1169_p2 = por %p1168_p9, %p1167_p7 }
  0x38   : > { %p1171_p4 = por %p1170_p1, %p1169_p2 }
  0x3a   : > { %p1172_p6 = pnand %p1171_p4, %p1165_p5 }
  0x3c   : > { %1175 = shalt.err (!%p1172_p6)
}
  0x3d   : > { %s1176_s10 = scalar_lea.vmem %s1408_s7, 2560  ;;  %s1266_s12 = smov [#allocation2]  }
  0x3e   : > { %p1177_p8 = scmp.ne.s32.totalorder %s1408_s7, %s1176_s10  ;;  %s1181_s13 = sshll.u32 %s1266_s12, 4  ;;  %s1182_s13 = int_to_ptr.vmem [resolvable:$false] %s1181_s13 }
  0x3f   : > { %s1183_s6 = scalar_lea.vmem %s1182_s13, 5120  ;;  %p1184_p3 = scmp.lt.s32.totalorder %s1408_s7, %s1182_s13 }
  0x40   : > { %p1179_p10 = pnand %p1177_p8, %p1163_p0  ;;  %p1185_p7 = scmp.lt.s32.totalorder %s1183_s6, %s1176_s10 }
  0x42   : > { %p1180_p13 = pneg %p1179_p10  ;;  %p1186_p9 = por %p1185_p7, %p1184_p3 }
  0x44   : > { %p1187_p2 = pnand %p1186_p9, %p1180_p13 }
  0x46   : > { %1190 = shalt.err (!%p1187_p2)
}
  0x47   : > { %s1267_s16 = smov 128   ;;  %s1268_s17 = smov 8  }
  0x48   : > { %1037 = dma.hbm_to_vmem [thread:$0]  (!%p1404_p11), %s1402_s14, 2560, %s1408_s7, %s1410_s15, %s1267_s16, %s1267_s16, %s1268_s17  }
  0x49   : > { %p1848_p0 = scmp.ne.s32.totalorder %s1843_s26, 0 }
  0x4a   : > { %s1441_s23 = sand.u32 (!%p1848_p0), 1, %s1253_s19   ;;  %p1849_p5 = scmp.ne.s32.totalorder (!%p1848_p0), %s1841_s24, 0 }
  0x4b   : > { %221 = sbr.rel (%p1848_p0) target bundleno = 565 (0x235), region = 40  ;;  %s224_s11 = scalar_lea.sflag (!%p1848_p0), [#allocation3], %s1441_s23 }
  0x4c   : > { %s1021_s27 = smul.u32 (!%p1848_p0), 160, %s1441_s23 }
  0x4e   : > { %s1447_s29 = scalar_lea.vmem (!%p1848_p0), [#allocation2], %s1021_s27 }
  0x52   : > { %1236 = dma.done.wait (%p1849_p5), %s224_s11, 2560  }
  0x53   : > { %1238 = vsyncadd (%p1849_p5), %s224_s11, 4294964736  ;;  %p1850_p11 = scmp.eq.s32.totalorder %s1323_s22, 0 }
  0x55   : > { %1240 = dma.done.wait (%p1850_p11), [#allocation6], 1024   ;;  %p1851_p1 = pmov %p1850_p11 }
  0x56   : > { %v1458_v0 = vld [vmem:[%s1447_s29 + $0x10] sm:$0xff]  ;;  %v1461_v1 = vld [vmem:[%s1447_s29] sm:$0xff]  ;;  %v1466_v2 = vld [vmem:[%s1447_s29 + $0x18] sm:$0xff]  ;;  %s1741_s10 = scalar_lea.vmem [#allocation7], %s1021_s27  ;;  %s949_s12 = smul.u32 2560, %s1323_s22 }
  0x57   : > { %1242 = vsyncadd (%p1851_p1), [#allocation6], 4294966272  ;;  %285 = vadd.xlane.f32.xlu1 %v1458_v0  ;;  %281 = vadd.xlane.f32.xlu0 %v1461_v1  ;;  %v1469_v3 = vld [vmem:[%s1447_s29 + $0x8] sm:$0xff]  ;;  %v342_v5 = vmul.f32 %v1461_v1, %v1461_v1  ;;  %v345_v6 = vmul.f32 %v1466_v2, %v1466_v2  ;;  %v344_v7 = vmul.f32 %v1458_v0, %v1458_v0  ;;  %v1485_v9 = vld [vmem:[%s1447_s29 + $0x20] sm:$0xff]  ;;  %s844_s13 = sshll.u32 %s1741_s10, 4  ;;  %s831_s17 = scalar_lea.sflag [#allocation4], %s1441_s23  ;;  %s1784_s13 = int_to_ptr.vmem [resolvable:$true] %s844_s13 }
  0x58   : > { %v343_v4 = vmul.f32 %v1469_v3, %v1469_v3  ;;  %v1482_v8 = vld [vmem:[%s1447_s29 + $0x28] sm:$0xff]  ;;  %v1493_v11 = vld [vmem:[%s1447_s29 + $0x60] sm:$0xff]  ;;  %v1498_v13 = vld [vmem:[%s1447_s29 + $0x38] sm:$0xff]  ;;  %v346_v19 = vmul.f32 %v1485_v9, %v1485_v9  ;;  %s1782_s16 = scalar_lea.hbm %s1837_s5, %s949_s12  ;;  %s1191_s27 = scalar_lea.vmem %s1784_s13, 2560 }
  0x59   : > { %v1490_v10 = vld [vmem:[%s1447_s29 + $0x68] sm:$0xff]  ;;  %v1085_v12 = vld [vmem:[#allocation5] sm:$0xff]   ;;  %v1501_v14 = vld [vmem:[%s1447_s29 + $0x30] sm:$0xff]  ;;  %v347_v18 = vmul.f32 %v1482_v8, %v1482_v8  ;;  %v354_v22 = vmul.f32 %v1493_v11, %v1493_v11  ;;  %v349_v24 = vmul.f32 %v1498_v13, %v1498_v13  ;;  %p1192_p4 = scmp.ne.s32.totalorder %s1784_s13, %s1191_s27  ;;  %s1269_s11 = smov [#allocation7]  }
  0x5a   : > { %968 = vmatprep.subr.bf16.mxu0 %v1085_v12  ;;  %1004 = vmatprep.subr.bf16.mxu1 %v1085_v12  ;;  %v1086_v15 = vld [vmem:[#allocation5 + $0x8] sm:$0xff]   ;;  %v1506_v16 = vld [vmem:[%s1447_s29 + $0x78] sm:$0xff]  ;;  %v1509_v17 = vld [vmem:[%s1447_s29 + $0x70] sm:$0xff]  ;;  %v355_v21 = vmul.f32 %v1490_v10, %v1490_v10  ;;  %v348_v25 = vmul.f32 %v1501_v14, %v1501_v14 }
  0x5b   : > { %287 = vadd.xlane.f32.xlu1 %v1466_v2  ;;  %283 = vadd.xlane.f32.xlu0 %v1469_v3  ;;  %v1087_v20 = vld [vmem:[#allocation5 + $0x10] sm:$0xff]   ;;  %v1088_v23 = vld [vmem:[#allocation5 + $0x18] sm:$0xff]   ;;  %v1089_v26 = vld [vmem:[#allocation5 + $0x20] sm:$0xff]   ;;  %v357_v27 = vmul.f32 %v1506_v16, %v1506_v16  ;;  %v356_v28 = vmul.f32 %v1509_v17, %v1509_v17  ;;  %p1193_p6 = pnand %p1192_p4, %p1393_p12 }
  0x5c   : > { %969 = vmatpush3.bf16.msra.mxu0 %v1085_v12  ;;  %1012 = vmatpush3.bf16.msra.mxu1 %v1085_v12  ;;  %v1090_v29 = vld [vmem:[#allocation5 + $0x28] sm:$0xff]   ;;  %v1091_v30 = vld [vmem:[#allocation5 + $0x30] sm:$0xff]   ;;  %v1533_v32 = vld [vmem:[%s1447_s29 + $0x40] sm:$0xff] }
  0x5d   : > { %970 = vmatprep.subr.bf16.mxu0 %v1086_v15  ;;  %1005 = vmatprep.subr.bf16.mxu1 %v1086_v15  ;;  %v1530_v31 = vld [vmem:[%s1447_s29 + $0x48] sm:$0xff]  ;;  %v1092_v33 = vld [vmem:[#allocation5 + $0x38] sm:$0xff]   ;;  %v1541_v35 = vld [vmem:[%s1447_s29 + $0x80] sm:$0xff]  ;;  %v350_v41 = vmul.f32 %v1533_v32, %v1533_v32  ;;  %p1194_p8 = pneg %p1193_p6 }
  0x5e   : > { %v1538_v34 = vld [vmem:[%s1447_s29 + $0x88] sm:$0xff]  ;;  %v1546_v36 = vld [vmem:[%s1447_s29 + $0x58] sm:$0xff]  ;;  %v1549_v37 = vld [vmem:[%s1447_s29 + $0x50] sm:$0xff]  ;;  %v351_v40 = vmul.f32 %v1530_v31, %v1530_v31  ;;  %v358_v43 = vmul.f32 %v1541_v35, %v1541_v35 }
  0x5f   : > { %364 = vadd.xlane.f32.xlu1 %v343_v4  ;;  %362 = vadd.xlane.f32.xlu0 %v342_v5  ;;  %v1554_v38 = vld [vmem:[%s1447_s29 + $0x98] sm:$0xff]  ;;  %v1557_v39 = vld [vmem:[%s1447_s29 + $0x90] sm:$0xff]  ;;  %v359_v42 = vmul.f32 %v1538_v34, %v1538_v34  ;;  %v353_v44 = vmul.f32 %v1546_v36, %v1546_v36  ;;  %v352_v45 = vmul.f32 %v1549_v37, %v1549_v37  ;;  %s1195_s29 = sshll.u32 %s1269_s11, 4  ;;  %s1196_s29 = int_to_ptr.vmem [resolvable:$false] %s1195_s29 }
  0x60   : > { %971 = vmatpush3.bf16.msra.mxu0 %v1086_v15  ;;  %1013 = vmatpush3.bf16.msra.mxu1 %v1086_v15  ;;  %v361_v46 = vmul.f32 %v1554_v38, %v1554_v38  ;;  %v360_v47 = vmul.f32 %v1557_v39, %v1557_v39  ;;  %s1197_s24 = scalar_lea.vmem %s1196_s29, 5120  ;;  %p1198_p10 = scmp.lt.s32.totalorder %s1784_s13, %s1196_s29 }
  0x61   : > { %972 = vmatprep.subr.bf16.mxu0 %v1087_v20  ;;  %1006 = vmatprep.subr.bf16.mxu1 %v1087_v20  ;;  %p1199_p13 = scmp.lt.s32.totalorder %s1197_s24, %s1191_s27 }
  0x63   : > { %368 = vadd.xlane.f32.xlu1 %v345_v6  ;;  %366 = vadd.xlane.f32.xlu0 %v344_v7  ;;  %p1200_p3 = por %p1199_p13, %p1198_p10 }
  0x64   : > { %973 = vmatpush3.bf16.msra.mxu0 %v1087_v20  ;;  %1014 = vmatpush3.bf16.msra.mxu1 %v1087_v20 }
  0x65   : > { %974 = vmatprep.subr.bf16.mxu0 %v1088_v23  ;;  %1007 = vmatprep.subr.bf16.mxu1 %v1088_v23  ;;  %p1201_p7 = pnand %p1200_p3, %p1194_p8 }
  0x67   : > { %291 = vadd.xlane.f32.xlu1 %v1482_v8  ;;  %289 = vadd.xlane.f32.xlu0 %v1485_v9 }
  0x68   : > { %975 = vmatpush3.bf16.msra.mxu0 %v1088_v23  ;;  %1015 = vmatpush3.bf16.msra.mxu1 %v1088_v23 }
  0x69   : > { %976 = vmatprep.subr.bf16.mxu0 %v1089_v26  ;;  %1008 = vmatprep.subr.bf16.mxu1 %v1089_v26 }
  0x6b   : > { %307 = vadd.xlane.f32.xlu1 %v1490_v10  ;;  %305 = vadd.xlane.f32.xlu0 %v1493_v11 }
  0x6c   : > { %977 = vmatpush3.bf16.msra.mxu0 %v1089_v26  ;;  %1016 = vmatpush3.bf16.msra.mxu1 %v1089_v26 }
  0x6d   : > { %978 = vmatprep.subr.bf16.mxu0 %v1090_v29  ;;  %1009 = vmatprep.subr.bf16.mxu1 %v1090_v29 }
  0x6f   : > { %295 = vadd.xlane.f32.xlu1 %v1498_v13  ;;  %293 = vadd.xlane.f32.xlu0 %v1501_v14 }
  0x70   : > { %979 = vmatpush3.bf16.msra.mxu0 %v1090_v29  ;;  %1017 = vmatpush3.bf16.msra.mxu1 %v1090_v29 }
  0x71   : > { %980 = vmatprep.subr.bf16.mxu0 %v1091_v30  ;;  %1010 = vmatprep.subr.bf16.mxu1 %v1091_v30 }
  0x73   : > { %311 = vadd.xlane.f32.xlu1 %v1506_v16  ;;  %309 = vadd.xlane.f32.xlu0 %v1509_v17 }
  0x74   : > { %981 = vmatpush3.bf16.msra.mxu0 %v1091_v30  ;;  %1018 = vmatpush3.bf16.msra.mxu1 %v1091_v30 }
  0x75   : > { %982 = vmatprep.subr.bf16.mxu0 %v1092_v33  ;;  %1011 = vmatprep.subr.bf16.mxu1 %v1092_v33 }
  0x77   : > { %372 = vadd.xlane.f32.xlu1 %v347_v18  ;;  %370 = vadd.xlane.f32.xlu0 %v346_v19 }
  0x78   : > { %983 = vmatpush3.bf16.msra.mxu0 %v1092_v33  ;;  %1019 = vmatpush3.bf16.msra.mxu1 %v1092_v33 }
  0x7b   : > { %388 = vadd.xlane.f32.xlu1 %v355_v21  ;;  %386 = vadd.xlane.f32.xlu0 %v354_v22 }
  0x7f   : > { %376 = vadd.xlane.f32.xlu1 %v349_v24  ;;  %374 = vadd.xlane.f32.xlu0 %v348_v25 }
  0x83   : > { %392 = vadd.xlane.f32.xlu1 %v357_v27  ;;  %390 = vadd.xlane.f32.xlu0 %v356_v28 }
  0x87   : > { %299 = vadd.xlane.f32.xlu1 %v1530_v31  ;;  %297 = vadd.xlane.f32.xlu0 %v1533_v32 }
  0x8b   : > { %315 = vadd.xlane.f32.xlu1 %v1538_v34  ;;  %313 = vadd.xlane.f32.xlu0 %v1541_v35 }
  0x8f   : > { %303 = vadd.xlane.f32.xlu1 %v1546_v36  ;;  %301 = vadd.xlane.f32.xlu0 %v1549_v37 }
  0x93   : > { %319 = vadd.xlane.f32.xlu1 %v1554_v38  ;;  %317 = vadd.xlane.f32.xlu0 %v1557_v39 }
  0x97   : > { %380 = vadd.xlane.f32.xlu1 %v351_v40  ;;  %378 = vadd.xlane.f32.xlu0 %v350_v41 }
  0x9b   : > { %396 = vadd.xlane.f32.xlu1 %v359_v42  ;;  %394 = vadd.xlane.f32.xlu0 %v358_v43 }
  0x9f   : > { %384 = vadd.xlane.f32.xlu1 %v353_v44  ;;  %382 = vadd.xlane.f32.xlu0 %v352_v45 }
  0xa3   : > { %400 = vadd.xlane.f32.xlu1 %v361_v46  ;;  %398 = vadd.xlane.f32.xlu0 %v360_v47  ;;  %v1588_v46 = vld [vmem:[%s1833_s1] ss:$0 sm:$0xff] }
  0xe4   : > { %v286_v48 = vpop.xlane.xlu1 %285  ;;  %v282_v49 = vpop.xlane.xlu0 %281 }
  0xe5   : > { %v322_v52 = vmul.f32 0.0078125, %v282_v49  ;;  %v1577_v54 = vmul.f32 0.0078125, %v286_v48 }
  0xe7   : > { %v422_v58 = vmul.f32 %v322_v52, %v322_v52  ;;  %v424_v4 = vmul.f32 %v1577_v54, %v1577_v54  ;;  %v482_v44 = vsub.f32 %v1461_v1, %v322_v52 }
  0xe8   : > { %v288_v50 = vpop.xlane.xlu1 %287  ;;  %v284_v51 = vpop.xlane.xlu0 %283 }
  0xe9   : > { %v323_v53 = vmul.f32 0.0078125, %v284_v51  ;;  %v325_v55 = vmul.f32 0.0078125, %v288_v50 }
  0xeb   : > { %v423_v59 = vmul.f32 %v323_v53, %v323_v53  ;;  %v425_v5 = vmul.f32 %v325_v55, %v325_v55  ;;  %v483_v42 = vsub.f32 %v1469_v3, %v323_v53  ;;  %v1595_v3 = vld [vmem:[%s1834_s2] ss:$0 sm:$0xff]  ;;  %v485_v1 = vsub.f32 %v1466_v2, %v325_v55 }
  0xec   : > { %v365_v56 = vpop.xlane.xlu1 %364  ;;  %v363_v57 = vpop.xlane.xlu0 %362 }
  0xed   : > { %v403_v60 = vmul.f32 0.0078125, %v365_v56  ;;  %v402_v61 = vmul.f32 0.0078125, %v363_v57  ;;  %v484_v57 = vsub.f32 %v1458_v0, %v1577_v54 }
  0xef   : > { %v443_v62 = vsub.f32 %v403_v60, %v423_v59  ;;  %v442_v63 = vsub.f32 %v402_v61, %v422_v58 }
  0xf0   : > { %v369_v6 = vpop.xlane.xlu1 %368  ;;  %v367_v7 = vpop.xlane.xlu0 %366 }
  0xf1   : > { %v463_v12 = vmax.f32 %v443_v62, 0.0  ;;  %v462_v15 = vmax.f32 %v442_v63, 0.0  ;;  %v405_v18 = vmul.f32 0.0078125, %v369_v6  ;;  %v404_v19 = vmul.f32 0.0078125, %v367_v7 }
  0xf3   : > { %v503_v20 = vadd.f32 1e-05, %v463_v12  ;;  %v502_v21 = vadd.f32 1e-05, %v462_v15  ;;  %v445_v22 = vsub.f32 %v405_v18, %v425_v5  ;;  %v444_v23 = vsub.f32 %v404_v19, %v424_v4 }
  0xf4   : > { %v292_v24 = vpop.xlane.xlu1 %291  ;;  %v290_v25 = vpop.xlane.xlu0 %289 }
  0xf5   : > { %1093 = vrsqrt.f32 %v503_v20  ;;  %v465_v26 = vmax.f32 %v445_v22, 0.0  ;;  %v464_v27 = vmax.f32 %v444_v23, 0.0  ;;  %v1583_v45 = vmul.f32 0.0078125, %v292_v24 }
  0xf6   : > { %1095 = vrsqrt.f32 %v502_v21  ;;  %v1590_v51 = vmul.f32 0.0078125, %v290_v25 }
  0xf7   : > { %v505_v28 = vadd.f32 1e-05, %v465_v26  ;;  %v504_v29 = vadd.f32 1e-05, %v464_v27  ;;  %v427_v58 = vmul.f32 %v1583_v45, %v1583_v45 }
  0xf8   : > { %v308_v30 = vpop.xlane.xlu1 %307  ;;  %v306_v33 = vpop.xlane.xlu0 %305  ;;  %v426_v5 = vmul.f32 %v1590_v51, %v1590_v51 }
  0xf9   : > { %1097 = vrsqrt.f32 %v505_v28  ;;  %v1603_v59 = vmul.f32 0.0078125, %v308_v30  ;;  %v1605_v61 = vmul.f32 0.0078125, %v306_v33 }
  0xfa   : > { %1099 = vrsqrt.f32 %v504_v29 }
  0xfb   : > { %v435_v15 = vmul.f32 %v1603_v59, %v1603_v59  ;;  %v434_v21 = vmul.f32 %v1605_v61, %v1605_v61 }
  0xfc   : > { %v296_v40 = vpop.xlane.xlu1 %295  ;;  %v294_v41 = vpop.xlane.xlu0 %293 }
  0xfd   : > { %v1618_v22 = vmul.f32 0.0078125, %v296_v40  ;;  %v1621_v33 = vmul.f32 0.0078125, %v294_v41 }
  0xff   : > { %v1094_v43 = vpop.eup %1093  ;;  %v429_v40 = vmul.f32 %v1618_v22, %v1618_v22 }
 0x100   : > { %v1096_v47 = vpop.eup %1095  ;;  %v312_v48 = vpop.xlane.xlu1 %311  ;;  %v543_v50 = vmul.f32 %v1094_v43, %v483_v42 }
 0x101   : > { %v310_v49 = vpop.xlane.xlu0 %309  ;;  %v542_v56 = vmul.f32 %v1096_v47, %v482_v44 }
 0x102   : > { %v570_v52 = vmul.f32 %v1588_v46, %v543_v50 }
 0x103   : > { %v1098_v53 = vpop.eup %1097  ;;  %v569_v4 = vmul.f32 %v1588_v46, %v542_v56  ;;  %v1626_v56 = vmul.f32 0.0078125, %v312_v48 }
 0x104   : > { %v1100_v60 = vpop.eup %1099  ;;  %v373_v62 = vpop.xlane.xlu1 %372  ;;  %v597_v2 = vadd.f32 %v1595_v3, %v570_v52  ;;  %v545_v55 = vmul.f32 %v1098_v53, %v485_v1  ;;  %v1628_v1 = vmul.f32 0.0078125, %v310_v49 }
 0x105   : > { %v371_v63 = vpop.xlane.xlu0 %370  ;;  %v407_v6 = vmul.f32 0.0078125, %v373_v62  ;;  %v544_v54 = vmul.f32 %v1100_v60, %v484_v57  ;;  %v596_v7 = vadd.f32 %v1595_v3, %v569_v4  ;;  %v428_v62 = vmul.f32 %v1621_v33, %v1621_v33 }
 0x106   : > { %v406_v0 = vmul.f32 0.0078125, %v371_v63  ;;  %v572_v12 = vmul.f32 %v1588_v46, %v545_v55  ;;  %v437_v48 = vmul.f32 %v1626_v56, %v1626_v56  ;;  %v436_v49 = vmul.f32 %v1628_v1, %v1628_v1 }
 0x107   : > { %v447_v18 = vsub.f32 %v407_v6, %v427_v58  ;;  %v571_v20 = vmul.f32 %v1588_v46, %v544_v54  ;;  %v616_v24 = vpack.c.bf16 %v597_v2, %v596_v7 }
 0x108   : > { %v446_v19 = vsub.f32 %v406_v0, %v426_v5  ;;  %v389_v23 = vpop.xlane.xlu1 %388  ;;  %v599_v26 = vadd.f32 %v1595_v3, %v572_v12 }
 0x109   : > { %v387_v25 = vpop.xlane.xlu0 %386  ;;  %v467_v27 = vmax.f32 %v447_v18, 0.0  ;;  %v415_v29 = vmul.f32 0.0078125, %v389_v23  ;;  %984 = vmatprep.mubr.bf16.mxu0 %v616_v24  ;;  %v598_v42 = vadd.f32 %v1595_v3, %v571_v20 }
 0x10a   : > { %v466_v28 = vmax.f32 %v446_v19, 0.0  ;;  %v414_v30 = vmul.f32 0.0078125, %v387_v25 }
 0x10b   : > { %v507_v43 = vadd.f32 1e-05, %v467_v27  ;;  %v455_v47 = vsub.f32 %v415_v29, %v435_v15  ;;  %v617_v53 = vpack.c.bf16 %v599_v26, %v598_v42  ;;  %v487_v27 = vsub.f32 %v1482_v8, %v1583_v45 }
 0x10c   : > { %v506_v44 = vadd.f32 1e-05, %v466_v28  ;;  %v454_v50 = vsub.f32 %v414_v30, %v434_v21  ;;  %v377_v52 = vpop.xlane.xlu1 %376  ;;  %v486_v29 = vsub.f32 %v1485_v9, %v1590_v51  ;;  %v494_v45 = vsub.f32 %v1493_v11, %v1605_v61 }
 0x10d   : > { %v375_v57 = vpop.xlane.xlu0 %374  ;;  %1101 = vrsqrt.f32 %v507_v43  ;;  %v475_v41 = vmax.f32 %v455_v47, 0.0  ;;  %v409_v60 = vmul.f32 0.0078125, %v377_v52  ;;  %985 = vmatmul.mubr.bf16.vlgmr.msra.gmra.mrb[0].mxu0 %v617_v53  ;;  %v495_v52 = vsub.f32 %v1490_v10, %v1603_v59 }
 0x10e   : > { %v474_v58 = vmax.f32 %v454_v50, 0.0  ;;  %1103 = vrsqrt.f32 %v506_v44  ;;  %v408_v63 = vmul.f32 0.0078125, %v375_v57  ;;  %v488_v11 = vsub.f32 %v1501_v14, %v1621_v33 }
 0x10f   : > { %v515_v4 = vadd.f32 1e-05, %v475_v41  ;;  %v449_v55 = vsub.f32 %v409_v60, %v429_v40 }
 0x110   : > { %v514_v2 = vadd.f32 1e-05, %v474_v58  ;;  %v448_v5 = vsub.f32 %v408_v63, %v428_v62  ;;  %v393_v6 = vpop.xlane.xlu1 %392  ;;  %v489_v63 = vsub.f32 %v1498_v13, %v1618_v22 }
 0x111   : > { %v391_v0 = vpop.xlane.xlu0 %390  ;;  %1105 = vrsqrt.f32 %v515_v4  ;;  %v469_v54 = vmax.f32 %v449_v55, 0.0  ;;  %v417_v7 = vmul.f32 0.0078125, %v393_v6 }
 0x112   : > { %v416_v12 = vmul.f32 0.0078125, %v391_v0  ;;  %1107 = vrsqrt.f32 %v514_v2  ;;  %v468_v15 = vmax.f32 %v448_v5, 0.0 }
 0x113   : > { %v509_v18 = vadd.f32 1e-05, %v469_v54  ;;  %v457_v19 = vsub.f32 %v417_v7, %v437_v48  ;;  %v497_v54 = vsub.f32 %v1506_v16, %v1626_v56 }
 0x114   : > { %v456_v20 = vsub.f32 %v416_v12, %v436_v49  ;;  %v508_v21 = vadd.f32 1e-05, %v468_v15  ;;  %v300_v23 = vpop.xlane.xlu1 %299  ;;  %v496_v12 = vsub.f32 %v1509_v17, %v1628_v1 }
 0x115   : > { %v298_v24 = vpop.xlane.xlu0 %297  ;;  %1109 = vrsqrt.f32 %v509_v18  ;;  %v477_v25 = vmax.f32 %v457_v19, 0.0  ;;  %v1653_v61 = vmul.f32 0.0078125, %v300_v23 }
 0x116   : > { %v476_v26 = vmax.f32 %v456_v20, 0.0  ;;  %1111 = vrsqrt.f32 %v508_v21  ;;  %v1657_v13 = vmul.f32 0.0078125, %v298_v24 }
 0x117   : > { %v1102_v28 = vpop.eup %1101  ;;  %v517_v30 = vadd.f32 1e-05, %v477_v25  ;;  %v431_v15 = vmul.f32 %v1653_v61, %v1653_v61 }
 0x118   : > { %v516_v42 = vadd.f32 1e-05, %v476_v26  ;;  %v1104_v43 = vpop.eup %1103  ;;  %v316_v44 = vpop.xlane.xlu1 %315  ;;  %v547_v50 = vmul.f32 %v1102_v28, %v487_v27  ;;  %v430_v26 = vmul.f32 %v1657_v13, %v1657_v13 }
 0x119   : > { %v314_v47 = vpop.xlane.xlu0 %313  ;;  %1113 = vrsqrt.f32 %v517_v30  ;;  %v546_v40 = vmul.f32 %v1104_v43, %v486_v29  ;;  %v1667_v18 = vmul.f32 0.0078125, %v316_v44 }
 0x11a   : > { %1115 = vrsqrt.f32 %v516_v42  ;;  %v574_v53 = vmul.f32 %v1588_v46, %v547_v50  ;;  %v1669_v19 = vmul.f32 0.0078125, %v314_v47 }
 0x11b   : > { %v1106_v8 = vpop.eup %1105  ;;  %v573_v41 = vmul.f32 %v1588_v46, %v546_v40  ;;  %v439_v30 = vmul.f32 %v1667_v18, %v1667_v18 }
 0x11c   : > { %v1108_v57 = vpop.eup %1107  ;;  %v304_v9 = vpop.xlane.xlu1 %303  ;;  %v601_v58 = vadd.f32 %v1595_v3, %v574_v53  ;;  %v555_v60 = vmul.f32 %v1106_v8, %v495_v52  ;;  %v438_v47 = vmul.f32 %v1669_v19, %v1669_v19 }
 0x11d   : > { %v302_v51 = vpop.xlane.xlu0 %301  ;;  %v554_v62 = vmul.f32 %v1108_v57, %v494_v45  ;;  %v600_v10 = vadd.f32 %v1595_v3, %v573_v41  ;;  %v1682_v50 = vmul.f32 0.0078125, %v304_v9 }
 0x11e   : > { %v582_v59 = vmul.f32 %v1588_v46, %v555_v60  ;;  %v1685_v60 = vmul.f32 0.0078125, %v302_v51 }
 0x11f   : > { %v1110_v4 = vpop.eup %1109  ;;  %v618_v48 = vpack.c.bf16 %v601_v58, %v600_v10  ;;  %v581_v5 = vmul.f32 %v1588_v46, %v554_v62  ;;  %v433_v9 = vmul.f32 %v1682_v50, %v1682_v50 }
 0x120   : > { %v1112_v2 = vpop.eup %1111  ;;  %v320_v55 = vpop.xlane.xlu1 %319  ;;  %v609_v6 = vadd.f32 %v1595_v3, %v582_v59  ;;  %v549_v0 = vmul.f32 %v1110_v4, %v489_v63 }
 0x121   : > { %v318_v49 = vpop.xlane.xlu0 %317  ;;  %v548_v22 = vmul.f32 %v1112_v2, %v488_v11  ;;  %988 = vmatprep.mubr.bf16.mxu0 %v618_v48  ;;  %v608_v14 = vadd.f32 %v1595_v3, %v581_v5  ;;  %v1690_v11 = vmul.f32 0.0078125, %v320_v55 }
 0x122   : > { %v576_v33 = vmul.f32 %v1588_v46, %v549_v0  ;;  %v1692_v2 = vmul.f32 0.0078125, %v318_v49 }
 0x123   : > { %v1114_v7 = vpop.eup %1113  ;;  %v622_v23 = vpack.c.bf16 %v609_v6, %v608_v14  ;;  %v575_v56 = vmul.f32 %v1588_v46, %v548_v22  ;;  %v441_v55 = vmul.f32 %v1690_v11, %v1690_v11 }
 0x124   : > { %v1116_v20 = vpop.eup %1115  ;;  %v381_v21 = vpop.xlane.xlu1 %380  ;;  %v603_v24 = vadd.f32 %v1595_v3, %v576_v33  ;;  %v557_v25 = vmul.f32 %v1114_v7, %v497_v54  ;;  %v432_v54 = vmul.f32 %v1685_v60, %v1685_v60  ;;  %v440_v49 = vmul.f32 %v1692_v2, %v1692_v2 }
 0x125   : > { %v379_v16 = vpop.xlane.xlu0 %378  ;;  %v411_v17 = vmul.f32 0.0078125, %v381_v21  ;;  %v556_v27 = vmul.f32 %v1116_v20, %v496_v12  ;;  %996 = vmatprep.mubr.bf16.mxu1 %v622_v23  ;;  %v602_v28 = vadd.f32 %v1595_v3, %v575_v56 }
 0x126   : > { %v410_v1 = vmul.f32 0.0078125, %v379_v16  ;;  %v584_v29 = vmul.f32 %v1588_v46, %v557_v25 }
 0x127   : > { %v451_v42 = vsub.f32 %v411_v17, %v431_v15  ;;  %v583_v44 = vmul.f32 %v1588_v46, %v556_v27  ;;  %v619_v52 = vpack.c.bf16 %v603_v24, %v602_v28 }
 0x128   : > { %v450_v43 = vsub.f32 %v410_v1, %v430_v26  ;;  %v397_v40 = vpop.xlane.xlu1 %396  ;;  %v611_v8 = vadd.f32 %v1595_v3, %v584_v29  ;;  %v491_v29 = vsub.f32 %v1530_v31, %v1653_v61  ;;  %v498_v31 = vsub.f32 %v1541_v35, %v1669_v19 }
 0x129   : > { %v395_v53 = vpop.xlane.xlu0 %394  ;;  %v471_v45 = vmax.f32 %v451_v42, 0.0  ;;  %v419_v41 = vmul.f32 0.0078125, %v397_v40  ;;  %989 = vmatmul.mubr.bf16.gmra.mrb[4].mxu0 %v619_v52  ;;  %v610_v62 = vadd.f32 %v1595_v3, %v583_v44  ;;  %v490_v42 = vsub.f32 %v1533_v32, %v1657_v13 }
 0x12a   : > { %v470_v57 = vmax.f32 %v450_v43, 0.0  ;;  %v418_v58 = vmul.f32 0.0078125, %v395_v53  ;;  %v499_v53 = vsub.f32 %v1538_v34, %v1667_v18 }
 0x12b   : > { %v511_v63 = vadd.f32 1e-05, %v471_v45  ;;  %v459_v59 = vsub.f32 %v419_v41, %v439_v30  ;;  %v623_v5 = vpack.c.bf16 %v611_v8, %v610_v62  ;;  %v493_v62 = vsub.f32 %v1546_v36, %v1682_v50 }
 0x12c   : > { %v510_v10 = vadd.f32 1e-05, %v470_v57  ;;  %v458_v4 = vsub.f32 %v418_v58, %v438_v47  ;;  %v385_v48 = vpop.xlane.xlu1 %384  ;;  %v501_v36 = vsub.f32 %v1554_v38, %v1690_v11 }
 0x12d   : > { %v383_v6 = vpop.xlane.xlu0 %382  ;;  %1117 = vrsqrt.f32 %v511_v63  ;;  %v479_v51 = vmax.f32 %v459_v59, 0.0  ;;  %v413_v22 = vmul.f32 0.0078125, %v385_v48  ;;  %997 = vmatmul.mubr.bf16.vlgmr.msra.gmra.mrb[0].mxu1 %v623_v5  ;;  %v492_v63 = vsub.f32 %v1549_v37, %v1685_v60 }
 0x12e   : > { %v478_v0 = vmax.f32 %v458_v4, 0.0  ;;  %1119 = vrsqrt.f32 %v510_v10  ;;  %v412_v14 = vmul.f32 0.0078125, %v383_v6  ;;  %v500_v37 = vsub.f32 %v1557_v39, %v1692_v2 }
 0x12f   : > { %v519_v33 = vadd.f32 1e-05, %v479_v51  ;;  %v453_v12 = vsub.f32 %v413_v22, %v433_v9 }
 0x130   : > { %v518_v7 = vadd.f32 1e-05, %v478_v0  ;;  %v452_v15 = vsub.f32 %v412_v14, %v432_v54  ;;  %v401_v20 = vpop.xlane.xlu1 %400 }
 0x131   : > { %v399_v21 = vpop.xlane.xlu0 %398  ;;  %1121 = vrsqrt.f32 %v519_v33  ;;  %v473_v23 = vmax.f32 %v453_v12, 0.0  ;;  %v421_v16 = vmul.f32 0.0078125, %v401_v20  ;;  %v1735_v12 = vld [vmem:[%s1836_s4] ss:$0 sm:$0xff] }
 0x132   : > { %v420_v56 = vmul.f32 0.0078125, %v399_v21  ;;  %1123 = vrsqrt.f32 %v518_v7  ;;  %v472_v24 = vmax.f32 %v452_v15, 0.0 }
 0x133   : > { %v513_v25 = vadd.f32 1e-05, %v473_v23  ;;  %v461_v26 = vsub.f32 %v421_v16, %v441_v55 }
 0x134   : > { %v460_v17 = vsub.f32 %v420_v56, %v440_v49  ;;  %v512_v1 = vadd.f32 1e-05, %v472_v24 }
 0x135   : > { %1125 = vrsqrt.f32 %v513_v25  ;;  %v481_v27 = vmax.f32 %v461_v26, 0.0 }
 0x136   : > { %v480_v28 = vmax.f32 %v460_v17, 0.0  ;;  %1127 = vrsqrt.f32 %v512_v1 }
 0x137   : > { %v1118_v30 = vpop.eup %1117  ;;  %v521_v43 = vadd.f32 1e-05, %v481_v27 }
 0x138   : > { %v520_v44 = vadd.f32 1e-05, %v480_v28  ;;  %v1120_v47 = vpop.eup %1119  ;;  %v551_v40 = vmul.f32 %v1118_v30, %v491_v29 }
 0x139   : > { %1129 = vrsqrt.f32 %v521_v43  ;;  %v550_v52 = vmul.f32 %v1120_v47, %v490_v42 }
 0x13a   : > { %1131 = vrsqrt.f32 %v520_v44  ;;  %v578_v8 = vmul.f32 %v1588_v46, %v551_v40 }
 0x13b   : > { %v1122_v45 = vpop.eup %1121  ;;  %v577_v61 = vmul.f32 %v1588_v46, %v550_v52 }
 0x13c   : > { %v1124_v57 = vpop.eup %1123  ;;  %v605_v32 = vadd.f32 %v1595_v3, %v578_v8  ;;  %v559_v13 = vmul.f32 %v1122_v45, %v499_v53 }
 0x13d   : > { %v604_v41 = vadd.f32 %v1595_v3, %v577_v61  ;;  %v558_v58 = vmul.f32 %v1124_v57, %v498_v31 }
 0x13e   : > { %v586_v34 = vmul.f32 %v1588_v46, %v559_v13 }
 0x13f   : > { %v1126_v18 = vpop.eup %1125  ;;  %v620_v10 = vpack.c.bf16 %v605_v32, %v604_v41  ;;  %v585_v35 = vmul.f32 %v1588_v46, %v558_v58 }
 0x140   : > { %v1128_v19 = vpop.eup %1127  ;;  %v613_v59 = vadd.f32 %v1595_v3, %v586_v34  ;;  %v553_v4 = vmul.f32 %v1126_v18, %v493_v62 }
 0x141   : > { %992 = vmatprep.mubr.bf16.mxu0 %v620_v10  ;;  %v612_v9 = vadd.f32 %v1595_v3, %v585_v35  ;;  %v552_v48 = vmul.f32 %v1128_v19, %v492_v63 }
 0x142   : > { %v580_v50 = vmul.f32 %v1588_v46, %v553_v4 }
 0x143   : > { %v1130_v5 = vpop.eup %1129  ;;  %v624_v60 = vpack.c.bf16 %v613_v59, %v612_v9  ;;  %v579_v6 = vmul.f32 %v1588_v46, %v552_v48 }
 0x144   : > { %v1132_v51 = vpop.eup %1131  ;;  %v607_v0 = vadd.f32 %v1595_v3, %v580_v50  ;;  %v561_v22 = vmul.f32 %v1130_v5, %v501_v36 }
 0x145   : > { %1000 = vmatprep.mubr.bf16.mxu1 %v624_v60  ;;  %v606_v54 = vadd.f32 %v1595_v3, %v579_v6  ;;  %v560_v14 = vmul.f32 %v1132_v51, %v500_v37 }
 0x146   : > { %v588_v38 = vmul.f32 %v1588_v46, %v561_v22 }
 0x147   : > { %v621_v11 = vpack.c.bf16 %v607_v0, %v606_v54  ;;  %v587_v33 = vmul.f32 %v1588_v46, %v560_v14 }
 0x148   : > { %v615_v7 = vadd.f32 %v1595_v3, %v588_v38 }
 0x149   : > { %993 = vmatmul.mubr.bf16.gmra.mrb[8].mxu0 %v621_v11  ;;  %v614_v39 = vadd.f32 %v1595_v3, %v587_v33 }
 0x14b   : > { %v625_v2 = vpack.c.bf16 %v615_v7, %v614_v39 }
 0x14d   : > { %1001 = vmatmul.mubr.bf16.gmra.mrb[4].mxu1 %v625_v2 }
 0x1e0   : > { %v986_v55 = vpop.f32.mrb[0].mxu0 }
 0x1e1   : > { %v740_v49 = vadd.f32 %v986_v55, %v1735_v12  ;;  %v731_v15 = vpop.f32.mrb[1].mxu0 }
 0x1e2   : > { %v732_v20 = vadd.f32 %v1735_v12, %v731_v15  ;;  %v987_v21 = vpop.f32.mrb[2].mxu0 }
 0x1e3   : > { %812 = vst [vmem:[%s1741_s10 + $0x10] sm:$0xff] %v740_v49  ;;  %v743_v46 = vadd.f32 %v987_v21, %v1735_v12  ;;  %v734_v3 = vpop.f32.mrb[3].mxu0 }
 0x1e4   : > { %810 = vst [vmem:[%s1741_s10] sm:$0xff] %v732_v20  ;;  %v735_v23 = vadd.f32 %v1735_v12, %v734_v3 }
 0x1e5   : > { %813 = vst [vmem:[%s1741_s10 + $0x18] sm:$0xff] %v743_v46 }
 0x1e6   : > { %811 = vst [vmem:[%s1741_s10 + $0x8] sm:$0xff] %v735_v23 }
 0x1fc   : > { %v990_v16 = vpop.f32.mrb[4].mxu0 }
 0x1fd   : > { %v756_v56 = vadd.f32 %v990_v16, %v1735_v12  ;;  %v747_v24 = vpop.f32.mrb[5].mxu0 }
 0x1fe   : > { %v748_v25 = vadd.f32 %v1735_v12, %v747_v24  ;;  %v991_v26 = vpop.f32.mrb[6].mxu0 }
 0x1ff   : > { %816 = vst [vmem:[%s1741_s10 + $0x30] sm:$0xff] %v756_v56  ;;  %v759_v17 = vadd.f32 %v991_v26, %v1735_v12  ;;  %v750_v1 = vpop.f32.mrb[7].mxu0 }
 0x200   : > { %814 = vst [vmem:[%s1741_s10 + $0x20] sm:$0xff] %v748_v25  ;;  %v751_v27 = vadd.f32 %v1735_v12, %v750_v1  ;;  %v998_v28 = vpop.f32.mrb[0].mxu1 }
 0x201   : > { %817 = vst [vmem:[%s1741_s10 + $0x38] sm:$0xff] %v759_v17  ;;  %v788_v29 = vadd.f32 %v998_v28, %v1735_v12  ;;  %v779_v30 = vpop.f32.mrb[1].mxu1 }
 0x202   : > { %815 = vst [vmem:[%s1741_s10 + $0x28] sm:$0xff] %v751_v27  ;;  %v780_v42 = vadd.f32 %v1735_v12, %v779_v30  ;;  %v999_v43 = vpop.f32.mrb[2].mxu1 }
 0x203   : > { %824 = vst [vmem:[%s1741_s10 + $0x70] sm:$0xff] %v788_v29  ;;  %v791_v44 = vadd.f32 %v999_v43, %v1735_v12  ;;  %v782_v47 = vpop.f32.mrb[3].mxu1 }
 0x204   : > { %822 = vst [vmem:[%s1741_s10 + $0x60] sm:$0xff] %v780_v42  ;;  %v783_v40 = vadd.f32 %v1735_v12, %v782_v47 }
 0x205   : > { %825 = vst [vmem:[%s1741_s10 + $0x78] sm:$0xff] %v791_v44 }
 0x206   : > { %823 = vst [vmem:[%s1741_s10 + $0x68] sm:$0xff] %v783_v40 }
 0x21c   : > { %v994_v52 = vpop.f32.mrb[8].mxu0 }
 0x21d   : > { %v772_v53 = vadd.f32 %v994_v52, %v1735_v12  ;;  %v763_v8 = vpop.f32.mrb[9].mxu0 }
 0x21e   : > { %v764_v45 = vadd.f32 %v1735_v12, %v763_v8  ;;  %v995_v31 = vpop.f32.mrb[10].mxu0 }
 0x21f   : > { %820 = vst [vmem:[%s1741_s10 + $0x50] sm:$0xff] %v772_v53  ;;  %v775_v61 = vadd.f32 %v995_v31, %v1735_v12  ;;  %v766_v57 = vpop.f32.mrb[11].mxu0 }
 0x220   : > { %818 = vst [vmem:[%s1741_s10 + $0x40] sm:$0xff] %v764_v45  ;;  %v767_v32 = vadd.f32 %v1735_v12, %v766_v57  ;;  %v1002_v13 = vpop.f32.mrb[4].mxu1 }
 0x221   : > { %821 = vst [vmem:[%s1741_s10 + $0x58] sm:$0xff] %v775_v61  ;;  %v804_v41 = vadd.f32 %v1002_v13, %v1735_v12  ;;  %v795_v58 = vpop.f32.mrb[5].mxu1 }
 0x222   : > { %819 = vst [vmem:[%s1741_s10 + $0x48] sm:$0xff] %v767_v32  ;;  %v796_v62 = vadd.f32 %v1735_v12, %v795_v58  ;;  %v1003_v34 = vpop.f32.mrb[6].mxu1 }
 0x223   : > { %828 = vst [vmem:[%s1741_s10 + $0x90] sm:$0xff] %v804_v41  ;;  %v807_v18 = vadd.f32 %v1003_v34, %v1735_v12  ;;  %v798_v63 = vpop.f32.mrb[7].mxu1 }
 0x224   : > { %826 = vst [vmem:[%s1741_s10 + $0x80] sm:$0xff] %v796_v62  ;;  %v799_v10 = vadd.f32 %v1735_v12, %v798_v63 }
 0x225   : > { %829 = vst [vmem:[%s1741_s10 + $0x98] sm:$0xff] %v807_v18 }
 0x226   : > { %827 = vst [vmem:[%s1741_s10 + $0x88] sm:$0xff] %v799_v10 }
 0x227   : > { %1204 = shalt.err (!%p1201_p7)
}
 0x228   : > { %s1205_s26 = scalar_lea.hbm %s1782_s16, 2560  ;;  %s1209_s7 = scalar_lea.hbm %s1837_s5, 5120 }
 0x229   : > { %p1206_p9 = scmp.ne.s32.totalorder %s1782_s16, %s1205_s26  ;;  %p1210_p5 = scmp.lt.u32.totalorder %s1782_s16, %s1837_s5 }
 0x22a   : > { %p1211_p11 = scmp.lt.u32.totalorder %s1209_s7, %s1205_s26  ;;  %p1213_p4 = scmp.lt.u32.totalorder %s1205_s26, %s1782_s16 }
 0x22b   : > { %p1207_p2 = pnand %p1206_p9, %p1393_p12 }
 0x22c   : > { %p1212_p1 = por %p1211_p11, %p1210_p5 }
 0x22d   : > { %p1208_p0 = pneg %p1207_p2 }
 0x22e   : > { %p1214_p6 = por %p1213_p4, %p1212_p1 }
 0x230   : > { %p1215_p8 = pnand %p1214_p6, %p1208_p0 }
 0x232   : > { %1218 = shalt.err (!%p1215_p8)
}
 0x233   : > { %s1270_s12 = smov 128   ;;  %s1271_s22 = smov 8  }
 0x234   : > { %1028 = dma.vmem_to_hbm [thread:$0]  (%p1393_p12), %s1784_s13, 2560, %s1782_s16, %s831_s17, %s1270_s12, %s1270_s12, %s1271_s22  }
 0x235 PF: > { %s859_s6 = sand.u32 1, %s1249_s18   ;;  %p1852_p10 = scmp.ne.s32.totalorder %s1842_s25, 0 }
 0x236   : > { %p1853_p13 = scmp.ge.s32.totalorder %s1261_s21, 2  ;;  %s860_s27 = scalar_lea.sflag [#allocation4], %s859_s6 }
 0x238   : > { %p1039_p3 = pnand %p1853_p13, %p1852_p10 }
 0x23a   : > { %1244 = dma.done.wait (!%p1039_p3), %s860_s27, 2560  }
 0x23b   : > { %1246 = vsyncadd (!%p1039_p3), %s860_s27, 4294964736  ;;  %p19_p7 = scmp.ge.s32.totalorder %s1358_s30, 4   ;;  %s1854_s18 = smov %s1253_s19 }
 0x23c   : > { %s1855_s19 = smov %s1257_s20  ;;  %s1856_s20 = smov %s1389_s8 }
 0x23d   : > { %s1857_s21 = smov %s1358_s30  ;;  %21 = sbr.rel (!%p19_p7) target bundleno = 6 (0x6), region = 89 }
 0x244   :  { %865 = vsyncpa [#allocation3], 1 }
 0x245   :  { %867 = vsyncpa [#allocation3 + $0x1], 1 }
 0x246   :  { %868 = vsyncpa [#allocation6], 1 }
 0x247   :  { %869 = vsyncpa [#allocation4], 1 }
 0x248   :  { %871 = vsyncpa [#allocation4 + $0x1], 1 }

</bundles_post_ra>
